<compile_context>
chip_gen: v7x
topology: tpu7x:2x2x1
jax: 0.10.0
libtpu: 0.0.40
codegen_flags: <defaults>
</compile_context>

<pallas_src>
import jax
import jax.numpy as jnp
import numpy as np
from jax import lax
from jax.experimental import pallas as pl
from jax.experimental.pallas import tpu as pltpu


def _make_kernel(N, H, W, Cin, Cout, d1, d2, eps):
    NH = N * H
    WCI, WCO = W * Cin, W * Cout
    inv_cnt = 1.0 / float(N * H * W)

    def kernel(xld_ref, w1f_ref, w2f_ref, pool_ref, poolT_ref,
               b1_ref, bs_ref, b2_ref, gamma_ref, beta_ref,
               out_ref, hpad_ref):
        # ---- conv1 (3x3, dil d1) + fused 1x1 skip: 3 lane-dense H-tap matmuls, f32 accum ------
        # W taps + channel mixing are folded into the banded weight; no concatenates needed.
        acc1 = jnp.zeros((NH, 2 * WCO), jnp.float32)
        for ky in range(3):
            tap = xld_ref[:, ky * d1:ky * d1 + H, :].reshape(NH, WCI)        # bf16, lane-dense
            acc1 = acc1 + jnp.dot(tap, w1f_ref[ky],
                                  preferred_element_type=jnp.float32)
        r1 = jnp.maximum(acc1[:, :WCO] + b1_ref[...], 0.0)                   # conv1 -> ReLU (f32)
        # skip(+bias) goes straight to the output tile: shrinks the live set across conv2.
        out_ref[...] = acc1[:, WCO:] + bs_ref[...]

        # ---- BatchNorm2d, training-mode stats in a single pass (f32) ---------------------------
        lane_sum = jnp.sum(r1, axis=0, keepdims=True)                        # (1, W*Cout)
        lane_sq = jnp.sum(r1 * r1, axis=0, keepdims=True)
        mean_c = jnp.dot(lane_sum, pool_ref[...],
                         preferred_element_type=jnp.float32) * inv_cnt       # (1, Cout)
        ex2_c = jnp.dot(lane_sq, pool_ref[...],
                        preferred_element_type=jnp.float32) * inv_cnt
        var_c = jnp.maximum(ex2_c - mean_c * mean_c, 0.0)                    # clamp cancellation
        scale_c = gamma_ref[...] * lax.rsqrt(var_c + eps)
        shift_c = beta_ref[...] - mean_c * scale_c
        scale_l = jnp.dot(scale_c, poolT_ref[...], preferred_element_type=jnp.float32)
        shift_l = jnp.dot(shift_c, poolT_ref[...], preferred_element_type=jnp.float32)
        bn = r1 * scale_l + shift_l                                          # one FMA / element

        # ---- H-halo pad for conv2 in a bf16 scratch (W halo is folded into the weights) --------
        zrow = jnp.zeros((N, d2, WCO), jnp.bfloat16)
        hpad_ref[:, 0:d2, :] = zrow                                          # full-lane-width stores
        hpad_ref[:, d2 + H:d2 + H + d2, :] = zrow
        hpad_ref[:, d2:d2 + H, :] = bn.astype(jnp.bfloat16).reshape(N, H, WCO)

        # ---- conv2 (3x3, dil d2): 3 lane-dense H-tap matmuls, f32 accum -------------------------
        acc2 = jnp.zeros((NH, WCO), jnp.float32)
        for ky in range(3):
            tap2 = hpad_ref[:, ky * d2:ky * d2 + H, :].reshape(NH, WCO)      # bf16
            acc2 = acc2 + jnp.dot(tap2, w2f_ref[ky],
                                  preferred_element_type=jnp.float32)
        r2 = jnp.maximum(acc2 + b2_ref[...], 0.0)

        # ---- residual add onto the already-written skip; dense 128-lane store -------------------
        out_ref[...] = out_ref[...] + r2

    return kernel


def _vmem_bytes(shape, dtype):
    """Lane/sublane-padded VMEM footprint of one buffer."""
    itemsize = jnp.dtype(dtype).itemsize
    dims = list(shape) if shape else [1]
    dims[-1] = -(-dims[-1] // 128) * 128
    if len(dims) >= 2:
        sub = max(8, 32 // itemsize)                 # f32 -> 8 sublanes, bf16 -> 16
        dims[-2] = -(-dims[-2] // sub) * sub
    total = itemsize
    for d in dims:
        total *= d
    return total


def dilated_res_block(x_nchw, params, d1, d2, eps=1e-5):
    """Pallas forward. x_nchw: (N, Cin, H, W) float32; returns (N, Cout, H, W)."""
    N, Cin, H, W = x_nchw.shape
    Cout = params["w1"].shape[0]
    WCI, WCO = W * Cin, W * Cout
    Hp1, Hp2 = H + 2 * d1, H + 2 * d2

    # ---- lane-dense input: NCHW -> (N, H, W*Cin); zero-pad H only (W halo folded into weights) ----
    x_nhwc = jnp.transpose(x_nchw, (0, 2, 3, 1)).astype(jnp.float32)
    xld = jnp.pad(x_nhwc.reshape(N, H, WCI), ((0, 0), (d1, d1), (0, 0))).astype(jnp.bfloat16)

    # ---- fold the W taps + channel mixing into banded weight matrices (one-time) -----------------
    def band(W_, dil):
        S = np.zeros((3, W_, W_), np.float32)        # S[kx, wi, wo] = 1 iff wi == wo + (kx-1)*dil
        for kx in range(3):
            for wo in range(W_):
                wi = wo + (kx - 1) * dil
                if 0 <= wi < W_:
                    S[kx, wi, wo] = 1.0
        return S

    # conv1: (3, W*Cin, W*Cout) banded; skip 1x1 fused as extra output columns on the centre H-tap.
    w1fold = jnp.einsum('kiz,ocyk->yiczo', band(W, d1), params["w1"]).reshape(3, WCI, WCO)
    ws2d = params["ws"][:, :, 0, 0]                                            # (Cout, Cin)
    wskip = jnp.einsum('iz,oc->iczo', jnp.eye(W, dtype=jnp.float32), ws2d).reshape(WCI, WCO)
    zskip = jnp.zeros_like(wskip)
    w1f = jnp.stack([jnp.concatenate([w1fold[0], zskip], axis=1),
                     jnp.concatenate([w1fold[1], wskip], axis=1),
                     jnp.concatenate([w1fold[2], zskip], axis=1)],
                    axis=0).astype(jnp.bfloat16)                               # (3, W*Cin, 2*W*Cout)
    # conv2: (3, W*Cout, W*Cout) banded.
    w2f = jnp.einsum('kiz,ocyk->yiczo', band(W, d2),
                     params["w2"]).reshape(3, WCO, WCO).astype(jnp.bfloat16)
    # TODO(synk): at real channel counts, zero-pad the folded K / N dims to 128 (v5e) or 256 (v6e/v7x)
    # multiples so the MXU runs full-width unmasked passes.

    # ---- per-channel params: lane-dense bias rows + channel pooling / broadcast matrices ----------
    lane_row = lambda p: jnp.tile(p.reshape(1, Cout).astype(jnp.float32), (1, W))   # (1, W*Cout)
    b1_l, bs_l, b2_l = lane_row(params["b1"]), lane_row(params["bs"]), lane_row(params["b2"])
    gamma = params["gamma"].reshape(1, Cout).astype(jnp.float32)
    beta = params["beta"].reshape(1, Cout).astype(jnp.float32)
    pool = jnp.tile(jnp.eye(Cout, dtype=jnp.float32), (W, 1))                  # (W*Cout, Cout)
    poolT = jnp.transpose(pool)                                                # (Cout, W*Cout)

    kernel = _make_kernel(N, H, W, Cin, Cout, d1, d2, eps)
    vmem = pl.BlockSpec(memory_space=pltpu.MemorySpace.VMEM)

    # ---- generation-aware VMEM budget (lane-padded sizes, ~2x headroom, capped at 75% of physical) ----
    vmem_need = (
        _vmem_bytes(xld.shape, jnp.bfloat16)
        + _vmem_bytes(w1f.shape, jnp.bfloat16)
        + _vmem_bytes(w2f.shape, jnp.bfloat16)
        + _vmem_bytes(pool.shape, jnp.float32)
        + _vmem_bytes(poolT.shape, jnp.float32)
        + 3 * _vmem_bytes((1, WCO), jnp.float32)
        + 2 * _vmem_bytes((1, Cout), jnp.float32)
        + _vmem_bytes((N * H, WCO), jnp.float32)                # output slab
        + _vmem_bytes((N, Hp2, WCO), jnp.bfloat16)              # bf16 hpad scratch
        + 6 * _vmem_bytes((N * H, 2 * WCO), jnp.float32)        # f32 working values (acc1/r1/bn/acc2/..)
    )
    try:
        vmem_cap = int(pltpu.get_tpu_info().vmem_capacity_bytes)
    except Exception:
        vmem_cap = 64 * 2 ** 20                                 # conservative: v7x per-TC VMEM
    vmem_limit = int(min(int(0.75 * vmem_cap), max(2 * vmem_need, 4 * 2 ** 20)))

    out2d = pl.pallas_call(
        kernel,
        out_shape=jax.ShapeDtypeStruct((N * H, WCO), jnp.float32),
        in_specs=[vmem] * 10,
        out_specs=vmem,
        scratch_shapes=[pltpu.VMEM((N, Hp2, WCO), jnp.bfloat16)],
        compiler_params=pltpu.CompilerParams(vmem_limit_bytes=vmem_limit),
    )(xld, w1f, w2f, pool, poolT, b1_l, bs_l, b2_l, gamma, beta)

    out_nhwc = out2d.reshape(N, H, W, Cout)
    return jnp.transpose(out_nhwc, (0, 3, 1, 2))                # back to NCHW


def ref_forward(x_nchw, params, d1, d2, eps=1e-5):
    """Pure-JAX reference (matches the PyTorch module in training mode)."""
    dn = ("NCHW", "OIHW", "NCHW")
    y = lax.conv_general_dilated(x_nchw, params["w1"], (1, 1),
                                 [(d1, d1), (d1, d1)], rhs_dilation=(d1, d1),
                                 dimension_numbers=dn) + params["b1"].reshape(1, -1, 1, 1)
    y = jnp.maximum(y, 0.0)
    mean = jnp.mean(y, axis=(0, 2, 3), keepdims=True)
    var = jnp.mean((y - mean) ** 2, axis=(0, 2, 3), keepdims=True)
    y = (params["gamma"].reshape(1, -1, 1, 1) * (y - mean) / jnp.sqrt(var + eps)
         + params["beta"].reshape(1, -1, 1, 1))
    y = lax.conv_general_dilated(y, params["w2"], (1, 1),
                                 [(d2, d2), (d2, d2)], rhs_dilation=(d2, d2),
                                 dimension_numbers=dn) + params["b2"].reshape(1, -1, 1, 1)
    y = jnp.maximum(y, 0.0)
    s = lax.conv_general_dilated(x_nchw, params["ws"], (1, 1), [(0, 0), (0, 0)],
                                 dimension_numbers=dn) + params["bs"].reshape(1, -1, 1, 1)
    return y + s


if __name__ == "__main__":
    N, Cin, Cout, H, W = 2, 4, 8, 16, 16
    dil_1, dil_2 = 2, 4

    key = jax.random.PRNGKey(0)
    ks = jax.random.split(key, 9)
    params = {
        "w1": 0.2 * jax.random.normal(ks[0], (Cout, Cin, 3, 3), jnp.float32),
        "b1": 0.1 * jax.random.normal(ks[1], (Cout,), jnp.float32),
        "gamma": 1.0 + 0.1 * jax.random.normal(ks[2], (Cout,), jnp.float32),
        "beta": 0.1 * jax.random.normal(ks[3], (Cout,), jnp.float32),
        "w2": 0.2 * jax.random.normal(ks[4], (Cout, Cout, 3, 3), jnp.float32),
        "b2": 0.1 * jax.random.normal(ks[5], (Cout,), jnp.float32),
        "ws": 0.2 * jax.random.normal(ks[6], (Cout, Cin, 1, 1), jnp.float32),
        "bs": 0.1 * jax.random.normal(ks[7], (Cout,), jnp.float32),
    }
    x = jax.random.normal(ks[8], (N, Cin, H, W), jnp.float32)

    out = jax.block_until_ready(dilated_res_block(x, params, dil_1, dil_2))
    ref = jax.block_until_ready(ref_forward(x, params, dil_1, dil_2))

    assert out.shape == (N, Cout, H, W)
    np.testing.assert_allclose(np.asarray(out), np.asarray(ref), rtol=5e-2, atol=5e-2)
    print("KERNEL_OK")
</pallas_src>

<mosaic_0001>
module attributes {stable_mosaic.version = 11 : i64} {
  func.func @kernel(%arg0: memref<2x20x64xbf16, #tpu.memory_space<vmem>>, %arg1: memref<3x64x256xbf16, #tpu.memory_space<vmem>>, %arg2: memref<3x128x128xbf16, #tpu.memory_space<vmem>>, %arg3: memref<128x8xf32, #tpu.memory_space<vmem>>, %arg4: memref<8x128xf32, #tpu.memory_space<vmem>>, %arg5: memref<1x128xf32, #tpu.memory_space<vmem>>, %arg6: memref<1x128xf32, #tpu.memory_space<vmem>>, %arg7: memref<1x128xf32, #tpu.memory_space<vmem>>, %arg8: memref<1x8xf32, #tpu.memory_space<vmem>>, %arg9: memref<1x8xf32, #tpu.memory_space<vmem>>, %arg10: memref<32x128xf32, #tpu.memory_space<vmem>>, %arg11: memref<2x24x128xbf16, #tpu.memory_space<vmem>>) attributes {dimension_semantics = [], scalar_prefetch = 0 : i64, scratch_operands = 1 : i64, tpu.core_type = #tpu.core_type<tc>} {
    %cst = arith.constant 0.000000e+00 : f32
    %0 = vector.broadcast %cst : f32 to vector<32x256xf32>
    %c0 = arith.constant 0 : index
    %c0_0 = arith.constant 0 : index
    %c0_1 = arith.constant 0 : index
    %1 = vector.load %arg0[%c0, %c0_0, %c0_1] : memref<2x20x64xbf16, #tpu.memory_space<vmem>>, vector<2x16x64xbf16>
    %2 = vector.shape_cast %1 : vector<2x16x64xbf16> to vector<32x64xbf16>
    %c0_2 = arith.constant 0 : index
    %c0_3 = arith.constant 0 : index
    %c0_4 = arith.constant 0 : index
    %3 = vector.load %arg1[%c0_2, %c0_3, %c0_4] : memref<3x64x256xbf16, #tpu.memory_space<vmem>>, vector<1x64x256xbf16>
    %4 = vector.shape_cast %3 : vector<1x64x256xbf16> to vector<64x256xbf16>
    %cst_5 = arith.constant dense<0.000000e+00> : vector<32x256xf32>
    %5 = tpu.matmul %2, %4, %cst_5 {dimension_numbers = #tpu.dot_dimension_numbers<[1], [0], [0], [1], [0, 0, 1, 1], [], []>} : vector<32x64xbf16>, vector<64x256xbf16>, vector<32x256xf32> -> vector<32x256xf32>
    %6 = arith.addf %0, %5 : vector<32x256xf32>
    %c0_6 = arith.constant 0 : index
    %c2 = arith.constant 2 : index
    %c0_7 = arith.constant 0 : index
    %7 = vector.load %arg0[%c0_6, %c2, %c0_7] : memref<2x20x64xbf16, #tpu.memory_space<vmem>>, vector<2x16x64xbf16>
    %8 = vector.shape_cast %7 : vector<2x16x64xbf16> to vector<32x64xbf16>
    %c1 = arith.constant 1 : index
    %c0_8 = arith.constant 0 : index
    %c0_9 = arith.constant 0 : index
    %9 = vector.load %arg1[%c1, %c0_8, %c0_9] : memref<3x64x256xbf16, #tpu.memory_space<vmem>>, vector<1x64x256xbf16>
    %10 = vector.shape_cast %9 : vector<1x64x256xbf16> to vector<64x256xbf16>
    %cst_10 = arith.constant dense<0.000000e+00> : vector<32x256xf32>
    %11 = tpu.matmul %8, %10, %cst_10 {dimension_numbers = #tpu.dot_dimension_numbers<[1], [0], [0], [1], [0, 0, 1, 1], [], []>} : vector<32x64xbf16>, vector<64x256xbf16>, vector<32x256xf32> -> vector<32x256xf32>
    %12 = arith.addf %6, %11 : vector<32x256xf32>
    %c0_11 = arith.constant 0 : index
    %c4 = arith.constant 4 : index
    %c0_12 = arith.constant 0 : index
    %13 = vector.load %arg0[%c0_11, %c4, %c0_12] : memref<2x20x64xbf16, #tpu.memory_space<vmem>>, vector<2x16x64xbf16>
    %14 = vector.shape_cast %13 : vector<2x16x64xbf16> to vector<32x64xbf16>
    %c2_13 = arith.constant 2 : index
    %c0_14 = arith.constant 0 : index
    %c0_15 = arith.constant 0 : index
    %15 = vector.load %arg1[%c2_13, %c0_14, %c0_15] : memref<3x64x256xbf16, #tpu.memory_space<vmem>>, vector<1x64x256xbf16>
    %16 = vector.shape_cast %15 : vector<1x64x256xbf16> to vector<64x256xbf16>
    %cst_16 = arith.constant dense<0.000000e+00> : vector<32x256xf32>
    %17 = tpu.matmul %14, %16, %cst_16 {dimension_numbers = #tpu.dot_dimension_numbers<[1], [0], [0], [1], [0, 0, 1, 1], [], []>} : vector<32x64xbf16>, vector<64x256xbf16>, vector<32x256xf32> -> vector<32x256xf32>
    %18 = arith.addf %12, %17 : vector<32x256xf32>
    %19 = vector.extract_strided_slice %18 {offsets = [0, 0], sizes = [32, 128], strides = [1, 1]} : vector<32x256xf32> to vector<32x128xf32>
    %c0_17 = arith.constant 0 : index
    %c0_18 = arith.constant 0 : index
    %20 = vector.load %arg5[%c0_17, %c0_18] : memref<1x128xf32, #tpu.memory_space<vmem>>, vector<1x128xf32>
    %21 = vector.broadcast %20 : vector<1x128xf32> to vector<32x128xf32>
    %22 = arith.addf %19, %21 : vector<32x128xf32>
    %cst_19 = arith.constant 0.000000e+00 : f32
    %23 = vector.broadcast %cst_19 : f32 to vector<32x128xf32>
    %24 = arith.maximumf %22, %23 : vector<32x128xf32>
    %25 = vector.extract_strided_slice %18 {offsets = [0, 128], sizes = [32, 128], strides = [1, 1]} : vector<32x256xf32> to vector<32x128xf32>
    %c0_20 = arith.constant 0 : index
    %c0_21 = arith.constant 0 : index
    %26 = vector.load %arg6[%c0_20, %c0_21] : memref<1x128xf32, #tpu.memory_space<vmem>>, vector<1x128xf32>
    %27 = vector.broadcast %26 : vector<1x128xf32> to vector<32x128xf32>
    %28 = arith.addf %25, %27 : vector<32x128xf32>
    %c0_22 = arith.constant 0 : index
    %c0_23 = arith.constant 0 : index
    %29 = vector.load %arg10[%c0_22, %c0_23] : memref<32x128xf32, #tpu.memory_space<vmem>>, vector<32x128xf32>
    tpu.vector_store %arg10[%c0_22, %c0_23], %28 {strides = array<i32>} : memref<32x128xf32, #tpu.memory_space<vmem>>, vector<32x128xf32>,
    %cst_24 = arith.constant dense<0.000000e+00> : vector<128xf32>
    %30 = vector.multi_reduction <add>, %24, %cst_24 [0] : vector<32x128xf32> to vector<128xf32>
    %31 = vector.shape_cast %30 : vector<128xf32> to vector<1x128xf32>
    %32 = arith.mulf %24, %24 : vector<32x128xf32>
    %cst_25 = arith.constant dense<0.000000e+00> : vector<128xf32>
    %33 = vector.multi_reduction <add>, %32, %cst_25 [0] : vector<32x128xf32> to vector<128xf32>
    %34 = vector.shape_cast %33 : vector<128xf32> to vector<1x128xf32>
    %c0_26 = arith.constant 0 : index
    %c0_27 = arith.constant 0 : index
    %35 = vector.load %arg3[%c0_26, %c0_27] : memref<128x8xf32, #tpu.memory_space<vmem>>, vector<128x8xf32>
    %cst_28 = arith.constant dense<0.000000e+00> : vector<1x8xf32>
    %36 = tpu.matmul %31, %35, %cst_28 {dimension_numbers = #tpu.dot_dimension_numbers<[1], [0], [0], [1], [0, 0, 1, 1], [], []>} : vector<1x128xf32>, vector<128x8xf32>, vector<1x8xf32> -> vector<1x8xf32>
    %cst_29 = arith.constant 0.001953125 : f32
    %37 = vector.broadcast %cst_29 : f32 to vector<1x8xf32>
    %38 = arith.mulf %36, %37 : vector<1x8xf32>
    %c0_30 = arith.constant 0 : index
    %c0_31 = arith.constant 0 : index
    %39 = vector.load %arg3[%c0_30, %c0_31] : memref<128x8xf32, #tpu.memory_space<vmem>>, vector<128x8xf32>
    %cst_32 = arith.constant dense<0.000000e+00> : vector<1x8xf32>
    %40 = tpu.matmul %34, %39, %cst_32 {dimension_numbers = #tpu.dot_dimension_numbers<[1], [0], [0], [1], [0, 0, 1, 1], [], []>} : vector<1x128xf32>, vector<128x8xf32>, vector<1x8xf32> -> vector<1x8xf32>
    %cst_33 = arith.constant 0.001953125 : f32
    %41 = vector.broadcast %cst_33 : f32 to vector<1x8xf32>
    %42 = arith.mulf %40, %41 : vector<1x8xf32>
    %43 = arith.mulf %38, %38 : vector<1x8xf32>
    %44 = arith.subf %42, %43 : vector<1x8xf32>
    %cst_34 = arith.constant 0.000000e+00 : f32
    %45 = vector.broadcast %cst_34 : f32 to vector<1x8xf32>
    %46 = arith.maximumf %44, %45 : vector<1x8xf32>
    %c0_35 = arith.constant 0 : index
    %c0_36 = arith.constant 0 : index
    %47 = vector.load %arg8[%c0_35, %c0_36] : memref<1x8xf32, #tpu.memory_space<vmem>>, vector<1x8xf32>
    %cst_37 = arith.constant 9.99999974E-6 : f32
    %48 = vector.broadcast %cst_37 : f32 to vector<1x8xf32>
    %49 = arith.addf %46, %48 : vector<1x8xf32>
    %50 = math.rsqrt %49 : vector<1x8xf32>
    %51 = arith.mulf %47, %50 : vector<1x8xf32>
    %c0_38 = arith.constant 0 : index
    %c0_39 = arith.constant 0 : index
    %52 = vector.load %arg9[%c0_38, %c0_39] : memref<1x8xf32, #tpu.memory_space<vmem>>, vector<1x8xf32>
    %53 = arith.mulf %38, %51 : vector<1x8xf32>
    %54 = arith.subf %52, %53 : vector<1x8xf32>
    %c0_40 = arith.constant 0 : index
    %c0_41 = arith.constant 0 : index
    %55 = vector.load %arg4[%c0_40, %c0_41] : memref<8x128xf32, #tpu.memory_space<vmem>>, vector<8x128xf32>
    %cst_42 = arith.constant dense<0.000000e+00> : vector<1x128xf32>
    %56 = tpu.matmul %51, %55, %cst_42 {dimension_numbers = #tpu.dot_dimension_numbers<[1], [0], [0], [1], [0, 0, 1, 1], [], []>} : vector<1x8xf32>, vector<8x128xf32>, vector<1x128xf32> -> vector<1x128xf32>
    %c0_43 = arith.constant 0 : index
    %c0_44 = arith.constant 0 : index
    %57 = vector.load %arg4[%c0_43, %c0_44] : memref<8x128xf32, #tpu.memory_space<vmem>>, vector<8x128xf32>
    %cst_45 = arith.constant dense<0.000000e+00> : vector<1x128xf32>
    %58 = tpu.matmul %54, %57, %cst_45 {dimension_numbers = #tpu.dot_dimension_numbers<[1], [0], [0], [1], [0, 0, 1, 1], [], []>} : vector<1x8xf32>, vector<8x128xf32>, vector<1x128xf32> -> vector<1x128xf32>
    %59 = vector.broadcast %56 : vector<1x128xf32> to vector<32x128xf32>
    %60 = arith.mulf %24, %59 : vector<32x128xf32>
    %61 = vector.broadcast %58 : vector<1x128xf32> to vector<32x128xf32>
    %62 = arith.addf %60, %61 : vector<32x128xf32>
    %cst_46 = arith.constant 0.000000e+00 : bf16
    %63 = vector.broadcast %cst_46 : bf16 to vector<2x4x128xbf16>
    %c0_47 = arith.constant 0 : index
    %c0_48 = arith.constant 0 : index
    %c0_49 = arith.constant 0 : index
    %64 = vector.load %arg11[%c0_47, %c0_48, %c0_49] : memref<2x24x128xbf16, #tpu.memory_space<vmem>>, vector<2x4x128xbf16>
    tpu.vector_store %arg11[%c0_47, %c0_48, %c0_49], %63 {strides = array<i32>} : memref<2x24x128xbf16, #tpu.memory_space<vmem>>, vector<2x4x128xbf16>,
    %c0_50 = arith.constant 0 : index
    %c20 = arith.constant 20 : index
    %c0_51 = arith.constant 0 : index
    %65 = vector.load %arg11[%c0_50, %c20, %c0_51] : memref<2x24x128xbf16, #tpu.memory_space<vmem>>, vector<2x4x128xbf16>
    tpu.vector_store %arg11[%c0_50, %c20, %c0_51], %63 {strides = array<i32>} : memref<2x24x128xbf16, #tpu.memory_space<vmem>>, vector<2x4x128xbf16>,
    %66 = arith.truncf %62 : vector<32x128xf32> to vector<32x128xbf16>
    %67 = vector.shape_cast %66 : vector<32x128xbf16> to vector<2x16x128xbf16>
    %c0_52 = arith.constant 0 : index
    %c4_53 = arith.constant 4 : index
    %c0_54 = arith.constant 0 : index
    %68 = vector.load %arg11[%c0_52, %c4_53, %c0_54] : memref<2x24x128xbf16, #tpu.memory_space<vmem>>, vector<2x16x128xbf16>
    tpu.vector_store %arg11[%c0_52, %c4_53, %c0_54], %67 {strides = array<i32>} : memref<2x24x128xbf16, #tpu.memory_space<vmem>>, vector<2x16x128xbf16>,
    %cst_55 = arith.constant 0.000000e+00 : f32
    %69 = vector.broadcast %cst_55 : f32 to vector<32x128xf32>
    %c0_56 = arith.constant 0 : index
    %c0_57 = arith.constant 0 : index
    %c0_58 = arith.constant 0 : index
    %70 = vector.load %arg11[%c0_56, %c0_57, %c0_58] : memref<2x24x128xbf16, #tpu.memory_space<vmem>>, vector<2x16x128xbf16>
    %71 = vector.shape_cast %70 : vector<2x16x128xbf16> to vector<32x128xbf16>
    %c0_59 = arith.constant 0 : index
    %c0_60 = arith.constant 0 : index
    %c0_61 = arith.constant 0 : index
    %72 = vector.load %arg2[%c0_59, %c0_60, %c0_61] : memref<3x128x128xbf16, #tpu.memory_space<vmem>>, vector<1x128x128xbf16>
    %73 = vector.shape_cast %72 : vector<1x128x128xbf16> to vector<128x128xbf16>
    %cst_62 = arith.constant dense<0.000000e+00> : vector<32x128xf32>
    %74 = tpu.matmul %71, %73, %cst_62 {dimension_numbers = #tpu.dot_dimension_numbers<[1], [0], [0], [1], [0, 0, 1, 1], [], []>} : vector<32x128xbf16>, vector<128x128xbf16>, vector<32x128xf32> -> vector<32x128xf32>
    %75 = arith.addf %69, %74 : vector<32x128xf32>
    %c0_63 = arith.constant 0 : index
    %c4_64 = arith.constant 4 : index
    %c0_65 = arith.constant 0 : index
    %76 = vector.load %arg11[%c0_63, %c4_64, %c0_65] : memref<2x24x128xbf16, #tpu.memory_space<vmem>>, vector<2x16x128xbf16>
    %77 = vector.shape_cast %76 : vector<2x16x128xbf16> to vector<32x128xbf16>
    %c1_66 = arith.constant 1 : index
    %c0_67 = arith.constant 0 : index
    %c0_68 = arith.constant 0 : index
    %78 = vector.load %arg2[%c1_66, %c0_67, %c0_68] : memref<3x128x128xbf16, #tpu.memory_space<vmem>>, vector<1x128x128xbf16>
    %79 = vector.shape_cast %78 : vector<1x128x128xbf16> to vector<128x128xbf16>
    %cst_69 = arith.constant dense<0.000000e+00> : vector<32x128xf32>
    %80 = tpu.matmul %77, %79, %cst_69 {dimension_numbers = #tpu.dot_dimension_numbers<[1], [0], [0], [1], [0, 0, 1, 1], [], []>} : vector<32x128xbf16>, vector<128x128xbf16>, vector<32x128xf32> -> vector<32x128xf32>
    %81 = arith.addf %75, %80 : vector<32x128xf32>
    %c0_70 = arith.constant 0 : index
    %c8 = arith.constant 8 : index
    %c0_71 = arith.constant 0 : index
    %82 = vector.load %arg11[%c0_70, %c8, %c0_71] : memref<2x24x128xbf16, #tpu.memory_space<vmem>>, vector<2x16x128xbf16>
    %83 = vector.shape_cast %82 : vector<2x16x128xbf16> to vector<32x128xbf16>
    %c2_72 = arith.constant 2 : index
    %c0_73 = arith.constant 0 : index
    %c0_74 = arith.constant 0 : index
    %84 = vector.load %arg2[%c2_72, %c0_73, %c0_74] : memref<3x128x128xbf16, #tpu.memory_space<vmem>>, vector<1x128x128xbf16>
    %85 = vector.shape_cast %84 : vector<1x128x128xbf16> to vector<128x128xbf16>
    %cst_75 = arith.constant dense<0.000000e+00> : vector<32x128xf32>
    %86 = tpu.matmul %83, %85, %cst_75 {dimension_numbers = #tpu.dot_dimension_numbers<[1], [0], [0], [1], [0, 0, 1, 1], [], []>} : vector<32x128xbf16>, vector<128x128xbf16>, vector<32x128xf32> -> vector<32x128xf32>
    %87 = arith.addf %81, %86 : vector<32x128xf32>
    %c0_76 = arith.constant 0 : index
    %c0_77 = arith.constant 0 : index
    %88 = vector.load %arg7[%c0_76, %c0_77] : memref<1x128xf32, #tpu.memory_space<vmem>>, vector<1x128xf32>
    %89 = vector.broadcast %88 : vector<1x128xf32> to vector<32x128xf32>
    %90 = arith.addf %87, %89 : vector<32x128xf32>
    %cst_78 = arith.constant 0.000000e+00 : f32
    %91 = vector.broadcast %cst_78 : f32 to vector<32x128xf32>
    %92 = arith.maximumf %90, %91 : vector<32x128xf32>
    %c0_79 = arith.constant 0 : index
    %c0_80 = arith.constant 0 : index
    %93 = vector.load %arg10[%c0_79, %c0_80] : memref<32x128xf32, #tpu.memory_space<vmem>>, vector<32x128xf32>
    %94 = arith.addf %93, %92 : vector<32x128xf32>
    %c0_81 = arith.constant 0 : index
    %c0_82 = arith.constant 0 : index
    %95 = vector.load %arg10[%c0_81, %c0_82] : memref<32x128xf32, #tpu.memory_space<vmem>>, vector<32x128xf32>
    tpu.vector_store %arg10[%c0_81, %c0_82], %94 {strides = array<i32>} : memref<32x128xf32, #tpu.memory_space<vmem>>, vector<32x128xf32>,
    return
  }
}

</mosaic_0001>

<bundles_post_ra>
// kernel: tpu_custom_call.1
= control target key start
LH: loop header
LB: loop body
LE: loop exit
PB: predicated region body
PF: predicated region fallthrough
CT: control target
= control target key end

     0   :  { %15 = vsyncpa [#allocation4], 0  ;;  %s2239_s0 = inlined_call_operand.vmem [shape: bf16[2,20,64], index: 0, kind: input, shape index: {}]   ;;  %s2240_s1 = inlined_call_operand.hbm [shape: bf16[3,64,256], index: 1, kind: input, shape index: {}]   ;;  %s2241_s2 = inlined_call_operand.hbm [shape: bf16[3,128,128], index: 2, kind: input, shape index: {}]   ;;  %s2242_s3 = inlined_call_operand.vmem [shape: f32[128,8], index: 3, kind: input, shape index: {}]   ;;  %s2243_s4 = inlined_call_operand.vmem [shape: f32[8,128], index: 4, kind: input, shape index: {}]   ;;  %s2244_s5 = inlined_call_operand.vmem [shape: f32[1,128], index: 5, kind: input, shape index: {}]   ;;  %s2245_s6 = inlined_call_operand.vmem [shape: f32[1,128], index: 6, kind: input, shape index: {}]   ;;  %s2246_s7 = inlined_call_operand.vmem [shape: f32[1,128], index: 7, kind: input, shape index: {}]   ;;  %s2247_s8 = inlined_call_operand.vmem [shape: f32[1,8], index: 8, kind: input, shape index: {}]   ;;  %s2248_s9 = inlined_call_operand.vmem [shape: f32[1,8], index: 9, kind: input, shape index: {}]   ;;  %s2249_s10 = inlined_call_operand.hbm [shape: f32[32,128], index: 10, kind: output, shape index: {}]  }
   0x1   :  { %16 = vsyncpa [#allocation7], 0 }
   0x2   :  { %17 = vsyncpa [#allocation5], 0  ;;  %s1863_s13 = smov [#allocation3]   ;;  %s1791_s17 = scalar_lea.hbm %s2240_s1, 3072 }
   0x3   :  { %s25_s14 = sshll.u32 %s1863_s13, 4  ;;  %p1792_p0 = scmp.ne.s32.totalorder %s2240_s1, %s1791_s17  ;;  %s26_s14 = int_to_ptr.vmem [resolvable:$true] %s25_s14 }
   0x4   :  { %p1795_p1 = scmp.lt.u32.totalorder %s1791_s17, %s2240_s1 }
   0x6   :  { %p1797_p2 = pnand %p1795_p1, %p1792_p0 }
   0x8   :  { %1800 = shalt.err (!%p1797_p2)
}
   0x9   :  { %s1801_s22 = scalar_lea.vmem %s26_s14, 3072  ;;  %p1806_p4 = scmp.lt.s32.totalorder %s26_s14, %s26_s14 }
   0xa   :  { %p1802_p3 = scmp.ne.s32.totalorder %s26_s14, %s1801_s22  ;;  %p1807_p5 = scmp.lt.s32.totalorder %s1801_s22, %s1801_s22 }
   0xc   :  { %p1808_p6 = por %p1807_p5, %p1806_p4 }
   0xe   :  { %p1809_p7 = pnand %p1808_p6, %p1802_p3 }
  0x10   :  { %1812 = shalt.err (!%p1809_p7)
}
  0x11   :  { %s1864_s23 = smov 128   ;;  %s1865_s24 = smov 8  }
  0x12   :  { %31 = dma.hbm_to_vmem [thread:$0]  %s2240_s1, 3072, %s26_s14, [#allocation4], %s1864_s23, %s1864_s23, %s1865_s24  }
  0x13   :  { %s1866_s27 = smov [#allocation6]   ;;  %s1813_s11 = scalar_lea.hbm %s2241_s2, 3072 }
  0x14   :  { %s37_s28 = sshll.u32 %s1866_s27, 4  ;;  %p1814_p8 = scmp.ne.s32.totalorder %s2241_s2, %s1813_s11  ;;  %s38_s28 = int_to_ptr.vmem [resolvable:$true] %s37_s28 }
  0x15   :  { %p1817_p9 = scmp.lt.u32.totalorder %s1813_s11, %s2241_s2 }
  0x17   :  { %p1819_p10 = pnand %p1817_p9, %p1814_p8 }
  0x19   :  { %1822 = shalt.err (!%p1819_p10)
}
  0x1a   :  { %s1823_s17 = scalar_lea.vmem %s38_s28, 3072  ;;  %p1828_p12 = scmp.lt.s32.totalorder %s38_s28, %s38_s28 }
  0x1b   :  { %p1824_p11 = scmp.ne.s32.totalorder %s38_s28, %s1823_s17  ;;  %p1829_p13 = scmp.lt.s32.totalorder %s1823_s17, %s1823_s17 }
  0x1d   :  { %p1830_p0 = por %p1829_p13, %p1828_p12 }
  0x1f   :  { %p1831_p1 = pnand %p1830_p0, %p1824_p11 }
  0x21   :  { %1834 = shalt.err (!%p1831_p1)
}
  0x22   :  { %s1867_s1 = smov 64   ;;  %s1868_s14 = smov 4  }
  0x23   :  { %43 = dma.hbm_to_vmem [thread:$0]  %s2241_s2, 3072, %s38_s28, [#allocation7], %s1867_s1, %s1867_s1, %s1868_s14  }
  0x24   :  { %1857 = dma.done.wait [#allocation4], 3072  }
  0x25   :  { %1858 = vsyncadd [#allocation4], 4294964224 }
  0x26   :  { %1859 = dma.done.wait [#allocation7], 3072  }
  0x27   :  { %1860 = vsyncadd [#allocation7], 4294964224  ;;  %v1869_v0 = vmov 0   ;;  %v1723_v1 = vld [vmem:[#allocation3 + $0x4] ss:$8 sps:$4 sm:$0xff]   ;;  %vm87_vm0 = vcmask 1042432  }
  0x28   :  { %305 = vmatprep.mubr.bf16.mxu0 %v1869_v0  ;;  %857 = vst [vmem:[#allocation2] sm:$0x3] %v1869_v0  ;;  %858 = vst [vmem:[#allocation2 + $0xc] sm:$0x3] %v1869_v0  ;;  %198 = vmatprep.mubr.bf16.mxu1 %v1869_v0  ;;  %v1725_v2 = vld [vmem:[#allocation3] ss:$8 sps:$4 sm:$0xff]  }
  0x29   :  { %859 = vst [vmem:[#allocation2 + $0x8] sm:$0xc] %v1869_v0  ;;  %860 = vst [vmem:[#allocation2 + $0x14] sm:$0xc] %v1869_v0  ;;  %273 = vmatprep.subr.bf16.mxu0 %v1723_v1  ;;  %v1726_v3 = vld [vmem:[#allocation3 + $0x14] ss:$8 sps:$4 sm:$0xff]  }
  0x2a   :  { %274 = vmatpush1.bf16.msra.mxu0 %v1725_v2  ;;  %v1728_v4 = vld [vmem:[#allocation3 + $0x10] ss:$8 sps:$4 sm:$0xff]   ;;  %v1729_v5 = vld [vmem:[#allocation3 + $0x24] ss:$8 sps:$4 sm:$0xff]   ;;  %v1737_v7 = vld [vmem:[#allocation3 + $0x40] ss:$8 sps:$4 sm:$0xff]  }
  0x2b   :  { %275 = vmatprep.subr.bf16.mxu0 %v1726_v3  ;;  %v1735_v6 = vld [vmem:[#allocation3 + $0x44] ss:$8 sps:$4 sm:$0xff]   ;;  %v1731_v8 = vld [vmem:[#allocation3 + $0x20] ss:$8 sps:$4 sm:$0xff]   ;;  %v1732_v9 = vld [vmem:[#allocation3 + $0x34] ss:$8 sps:$4 sm:$0xff]  }
  0x2c   :  { %166 = vmatprep.subr.bf16.mxu1 %v1735_v6  ;;  %v1734_v10 = vld [vmem:[#allocation3 + $0x30] ss:$8 sps:$4 sm:$0xff]   ;;  %v65_v11 = vld [vmem:[%s2239_s0] sm:$0xf]  ;;  %v1968_v12 = vld [vmem:[%s2239_s0 + $0x4] sm:$0xf] }
  0x2d   :  { %167 = vmatpush1.bf16.msra.mxu1 %v1737_v7  ;;  %v1742_v13 = vld [vmem:[#allocation3 + $0x54] ss:$8 sps:$4 sm:$0xff]   ;;  %v1744_v14 = vld [vmem:[#allocation3 + $0x50] ss:$8 sps:$4 sm:$0xff]   ;;  %v1973_v15 = vld [vmem:[%s2239_s0] sm:$0xc]  ;;  %v1361_v21 = vcombine.low %v65_v11, %v1968_v12 }
  0x2e   :  { %276 = vmatpush1.bf16.msra.mxu0 %v1728_v4  ;;  %v1741_v16 = vld [vmem:[#allocation3 + $0x84] ss:$8 sps:$4 sm:$0xff]   ;;  %v92_v17 = vrot.slane %v1968_v12, 5  ;;  %168 = vmatprep.subr.bf16.mxu1 %v1742_v13  ;;  %v1739_v19 = vld [vmem:[#allocation3 + $0x80] ss:$8 sps:$4 sm:$0xff]   ;;  %vm88_vm1 = vcmask 1046532  }
  0x2f   :  { %277 = vmatprep.subr.bf16.mxu0 %v1729_v5  ;;  %v1748_v18 = vld [vmem:[#allocation3 + $0x64] ss:$8 sps:$4 sm:$0xff]   ;;  %v1750_v20 = vld [vmem:[#allocation3 + $0x60] ss:$8 sps:$4 sm:$0xff]   ;;  %vm159_vm2 = vcmask 523264   ;;  %vm334_vm3 = vcmask 1041408   ;;  %vm1986_vm5 = vmor %vm87_vm0, %vm88_vm1 }
  0x30   :  { %v1747_v22 = vld [vmem:[#allocation3 + $0x94] ss:$8 sps:$4 sm:$0xff]   ;;  %vm335_vm4 = vcmask 1045508   ;;  %v1373_v23 = vrot.slane %v1973_v15, 10  ;;  %v1981_v24 = vld [vmem:[%s2239_s0 + $0x10] sm:$0xf] }
  0x31   :  { %169 = vmatpush1.bf16.msra.mxu1 %v1744_v14  ;;  %v339_v25 = vrot.slane %v1968_v12, 6  ;;  %v99_v26 = vrot.slane %v1981_v24, 5  ;;  %v1755_v27 = vld [vmem:[#allocation3 + $0x74] ss:$8 sps:$4 sm:$0xff]   ;;  %v94_v29 = vrot.slane %v92_v17, 4  ;;  %v346_v32 = vrot.slane %v1981_v24, 6  ;;  %vm2024_vm6 = vmor %vm334_vm3, %vm335_vm4 }
  0x32   :  { %278 = vmatpush1.bf16.msra.mxu0 %v1731_v8  ;;  %170 = vmatprep.subr.bf16.mxu1 %v1748_v18  ;;  %v1745_v30 = vld [vmem:[#allocation3 + $0x90] ss:$8 sps:$4 sm:$0xff]   ;;  %v67_v31 = vld [vmem:[%s2239_s0 + $0xc] sm:$0xf]  ;;  %v1754_v34 = vld [vmem:[#allocation3 + $0xa4] ss:$8 sps:$4 sm:$0xff]  }
  0x33   :  { %279 = vmatprep.subr.bf16.mxu0 %v1732_v9  ;;  %v1757_v33 = vld [vmem:[#allocation3 + $0x70] ss:$8 sps:$4 sm:$0xff]   ;;  %v77_v35 = vld [vmem:[%s2239_s0] sm:$0xe]  ;;  %v79_v40 = vld [vmem:[%s2239_s0 + $0xc] sm:$0xe]  ;;  %v1362_v51 = vcombine.low %v67_v31, %v1981_v24  ;;  %v340_v62 = vsel %vm2024_vm6, %v1373_v23, %v339_v25 }
  0x34   :  { %v78_v36 = vld [vmem:[%s2239_s0 + $0x8] sm:$0x1]  ;;  %v1347_v37 = vrot.slane %v77_v35, 9  ;;  %v341_v41 = vrot.slane %v339_v25, 4  ;;  %v80_v42 = vld [vmem:[%s2239_s0 + $0x14] sm:$0x1] }
  0x35   :  { %171 = vmatpush1.bf16.msra.mxu1 %v1750_v20  ;;  %v95_v38 = vrot.slane %v78_v36, 5  ;;  %v327_v39 = vld [vmem:[%s2239_s0 + $0x8] sm:$0x3]  ;;  %v101_v43 = vrot.slane %v99_v26, 4  ;;  %v328_v44 = vld [vmem:[%s2239_s0 + $0xc] sm:$0xc] }
  0x36   :  { %280 = vmatpush1.bf16.msra.mxu0 %v1734_v10  ;;  %172 = vmatprep.subr.bf16.mxu1 %v1755_v27  ;;  %v1752_v45 = vld [vmem:[#allocation3 + $0xa0] ss:$8 sps:$4 sm:$0xff]   ;;  %v93_v46 = vsel %vm1986_vm5, %v1347_v37, %v92_v17  ;;  %v1348_v48 = vrot.slane %v79_v40, 9  ;;  %v102_v49 = vrot.slane %v80_v42, 5  ;;  %v329_v50 = vld [vmem:[%s2239_s0 + $0x14] sm:$0x3] }
  0x37   :  { %412 = vmatprep.subr.bf16.mxu0 %v1741_v16  ;;  %v96_v47 = vsel %vm1986_vm5, %v94_v29, %v95_v38  ;;  %v1760_v52 = vld [vmem:[#allocation3 + $0xb4] ss:$8 sps:$4 sm:$0xff]   ;;  %v342_v54 = vrot.slane %v327_v39, 6  ;;  %v348_v55 = vrot.slane %v346_v32, 4  ;;  %v1374_v57 = vrot.slane %v328_v44, 10  ;;  %v525_v7 = vld [vmem:[%s2242_s3] sm:$0xff] }
  0x38   :  { %v1349_v53 = vcombine.low %v93_v46, %v96_v47  ;;  %v349_v58 = vrot.slane %v329_v50, 6  ;;  %v1758_v59 = vld [vmem:[#allocation3 + $0xb0] ss:$8 sps:$4 sm:$0xff]   ;;  %v100_v60 = vsel %vm1986_vm5, %v1348_v48, %v99_v26  ;;  %v103_v61 = vsel %vm1986_vm5, %v101_v43, %v102_v49  ;;  %v528_v10 = vld [vmem:[%s2242_s3 + $0x18] sm:$0xff]  ;;  %v529_v12 = vld [vmem:[%s2242_s3 + $0x20] sm:$0xff] }
  0x39   :  { %1371 = vmatmul.mubr.msk.bf16.vlgmr.msra.gmra.mrb[0].mxu0 %vm159_vm2, %v1361_v21  ;;  %173 = vmatpush1.bf16.msra.mxu1 %v1757_v33  ;;  %v343_v63 = vsel %vm2024_vm6, %v341_v41, %v342_v54  ;;  %v1350_v1 = vcombine.low %v100_v60, %v103_v61  ;;  %v347_v3 = vsel %vm2024_vm6, %v1374_v57, %v346_v32  ;;  %v1870_v6 = vmov 0.0|0.0   ;;  %v527_v9 = vld [vmem:[%s2242_s3 + $0x10] sm:$0xff]  ;;  %v530_v13 = vld [vmem:[%s2242_s3 + $0x28] sm:$0xff]  ;;  %v532_v16 = vld [vmem:[%s2242_s3 + $0x38] sm:$0xff] }
  0x3a   :  { %413 = vmatpush1.bf16.msra.mxu0 %v1739_v19  ;;  %315 = vmatprep.mubr.bf16.mxu0 %v1869_v0  ;;  %v1375_v2 = vcombine.low %v340_v62, %v343_v63  ;;  %v350_v4 = vsel %vm2024_vm6, %v348_v55, %v349_v58  ;;  %v2065_v11 = vpack.c.bf16 %v528_v10, %v527_v9  ;;  %v531_v15 = vld [vmem:[%s2242_s3 + $0x30] sm:$0xff]  ;;  %v533_v18 = vld [vmem:[%s2242_s3 + $0x40] sm:$0xff]  ;;  %v534_v19 = vld [vmem:[%s2242_s3 + $0x48] sm:$0xff]  ;;  %vm1871_vm7 = vmmov 0  }
  0x3b   :  { %414 = vmatprep.subr.bf16.mxu0 %v1747_v22  ;;  %v1376_v5 = vcombine.low %v347_v3, %v350_v4  ;;  %v2075_v14 = vpack.c.bf16 %v530_v13, %v529_v12  ;;  %v2085_v17 = vpack.c.bf16 %v532_v16, %v531_v15  ;;  %v2095_v20 = vpack.c.bf16 %v534_v19, %v533_v18  ;;  %v535_v21 = vld [vmem:[%s2242_s3 + $0x50] sm:$0xff]  ;;  %v536_v22 = vld [vmem:[%s2242_s3 + $0x58] sm:$0xff]  ;;  %v537_v24 = vld [vmem:[%s2242_s3 + $0x60] sm:$0xff] }
  0x3c   :  { %1359 = vmatmul.mubr.msk.bf16.vlgmr.msra.gmra.mrb[0].mxu1 %vm159_vm2, %v1349_v53  ;;  %v2105_v23 = vpack.c.bf16 %v536_v22, %v535_v21  ;;  %v538_v25 = vld [vmem:[%s2242_s3 + $0x68] sm:$0xff]  ;;  %v539_v27 = vld [vmem:[%s2242_s3 + $0x70] sm:$0xff]  ;;  %v540_v28 = vld [vmem:[%s2242_s3 + $0x78] sm:$0xff]  ;;  %vm694_vm8 = vcmask 64512  }
  0x3d   :  { %208 = vmatprep.mubr.bf16.mxu1 %v1869_v0  ;;  %v2115_v26 = vpack.c.bf16 %v538_v25, %v537_v24  ;;  %v2125_v29 = vpack.c.bf16 %v540_v28, %v539_v27  ;;  %v1387_v46 = vld [vmem:[%s2244_s5] ss:$0 sm:$0xff] }
  0x3e   :  { %415 = vmatpush1.bf16.msra.mxu0 %v1745_v30  ;;  %v1872_v30 = vmov 0.0   ;;  %v1775_v56 = vld [vmem:[#allocation6 + $0x28] sm:$0xff]  }
  0x3f   :  { %416 = vmatprep.subr.bf16.mxu0 %v1754_v34 }
  0x41   :  { %1372 = vmatmul.mubr.msk.bf16.gmra.mrb[4].mxu0 %vm159_vm2, %v1362_v51 }
  0x42   :  { %417 = vmatpush1.bf16.msra.mxu0 %v1752_v45  ;;  %444 = vmatprep.mubr.bf16.mxu0 %v1869_v0 }
  0x43   :  { %418 = vmatprep.subr.bf16.mxu0 %v1760_v52 }
  0x44   :  { %1360 = vmatmul.mubr.msk.bf16.gmra.mrb[4].mxu1 %vm159_vm2, %v1350_v1 }
  0x46   :  { %419 = vmatpush1.bf16.msra.mxu0 %v1758_v59 }
  0x47   :  { %1640 = vmatprep.subr.bf16.mxu0 %v1870_v6 }
  0x49   :  { %1385 = vmatmul.mubr.msk.bf16.vlgmr.msra.gmra.mrb[0].mxu0 %vm159_vm2, %v1375_v2 }
  0x4a   :  { %454 = vmatprep.mubr.bf16.mxu0 %v1869_v0  ;;  %v526_v0 = vld [vmem:[%s2242_s3 + $0x8] sm:$0xff] }
  0x4b   :  { %v2055_v8 = vpack.c.bf16 %v526_v0, %v525_v7 }
  0x4d   :  { %1642 = vmatpush3.bf16.msra.mxu0 %v2055_v8 }
  0x4e   :  { %1643 = vmatprep.subr.bf16.mxu0 %v1870_v6 }
  0x51   :  { %1386 = vmatmul.mubr.msk.bf16.gmra.mrb[4].mxu0 %vm159_vm2, %v1376_v5 }
  0x52   :  { %1645 = vmatpush3.bf16.msra.mxu0 %v2065_v11  ;;  %1532 = vmatprep.mubr.msk.f32.mxu0 %vm1871_vm7, %v1872_v30 }
  0x53   :  { %1646 = vmatprep.subr.bf16.mxu0 %v1870_v6 }
  0x56   :  { %1648 = vmatpush3.bf16.msra.mxu0 %v2075_v14 }
  0x57   :  { %1649 = vmatprep.subr.bf16.mxu0 %v1870_v6 }
  0x5a   :  { %1651 = vmatpush3.bf16.msra.mxu0 %v2085_v17 }
  0x5b   :  { %1652 = vmatprep.subr.bf16.mxu0 %v1870_v6 }
  0x5e   :  { %1654 = vmatpush3.bf16.msra.mxu0 %v2095_v20 }
  0x5f   :  { %1655 = vmatprep.subr.bf16.mxu0 %v1870_v6 }
  0x62   :  { %1657 = vmatpush3.bf16.msra.mxu0 %v2105_v23 }
  0x63   :  { %1658 = vmatprep.subr.bf16.mxu0 %v1870_v6 }
  0x66   :  { %1660 = vmatpush3.bf16.msra.mxu0 %v2115_v26 }
  0x67   :  { %1661 = vmatprep.subr.bf16.mxu0 %v1870_v6 }
  0x6a   :  { %1663 = vmatpush3.bf16.msra.mxu0 %v2125_v29 }
  0x6b   :  { %1664 = vmatprep.subr.bf16.mxu0 %v1870_v6 }
 0x10f   :  { %v200_v31 = vpop.f32.mrb[0].mxu1 }
 0x110   :  { %v202_v32 = vpop.f32.mrb[1].mxu1 }
 0x111   :  { %v204_v33 = vpop.f32.mrb[2].mxu1 }
 0x112   :  { %v206_v34 = vpop.f32.mrb[3].mxu1 }
 0x117   :  { %v210_v35 = vpop.f32.mrb[4].mxu1 }
 0x118   :  { %v212_v36 = vpop.f32.mrb[5].mxu1 }
 0x119   :  { %v214_v38 = vpop.f32.mrb[6].mxu1 }
 0x11a   :  { %v216_v41 = vpop.f32.mrb[7].mxu1 }
 0x11c   :  { %v446_v37 = vpop.f32.mrb[0].mxu0 }
 0x11d   :  { %v1688_v39 = vadd.f32 %v446_v37, %v200_v31  ;;  %v448_v40 = vpop.f32.mrb[1].mxu0 }
 0x11e   :  { %v2131_v42 = vadd.f32 %v448_v40, %v202_v32  ;;  %v450_v43 = vpop.f32.mrb[2].mxu0 }
 0x11f   :  { %v1690_v44 = vadd.f32 %v450_v43, %v204_v33  ;;  %v452_v45 = vpop.f32.mrb[3].mxu0  ;;  %v480_v49 = vadd.f32 %v1688_v39, %v1387_v46  ;;  %v690_v39 = vld [vmem:[%s2248_s9] sm:$0x1] }
 0x120   :  { %v2136_v47 = vadd.f32 %v452_v45, %v206_v34  ;;  %v1762_v43 = vld [vmem:[#allocation6 + $0x48] sm:$0xff]   ;;  %v1764_v45 = vld [vmem:[#allocation6 + $0x58] sm:$0xff]  }
 0x121   :  { %v481_v48 = vadd.f32 %v1690_v44, %v1387_v46  ;;  %v2142_v57 = vmax.f32 %v480_v49, 0.0  ;;  %v1763_v44 = vld [vmem:[#allocation6 + $0x50] sm:$0xff]  }
 0x122   :  { %v1767_v49 = vld [vmem:[#allocation6 + $0x70] sm:$0xff]  }
 0x123   :  { %v2138_v51 = vmax.f32 %v481_v48, 0.0  ;;  %v512_v13 = vmul.f32 %v2142_v57, %v2142_v57  ;;  %v1766_v48 = vld [vmem:[#allocation6 + $0x68] sm:$0xff]  }
 0x124   :  { %v456_v50 = vpop.f32.mrb[4].mxu0 }
 0x125   :  { %v1692_v52 = vadd.f32 %v456_v50, %v210_v35  ;;  %v458_v53 = vpop.f32.mrb[5].mxu0  ;;  %v503_v62 = vadd.f32 %v2138_v51, %v2142_v57  ;;  %v513_v10 = vmul.f32 %v2138_v51, %v2138_v51  ;;  %v1769_v50 = vld [vmem:[#allocation6] sm:$0xff]  }
 0x126   :  { %v2140_v54 = vadd.f32 %v458_v53, %v212_v36  ;;  %v460_v55 = vpop.f32.mrb[6].mxu0  ;;  %v686_v36 = vld [vmem:[%s2247_s8] sm:$0x1] }
 0x127   :  { %v482_v58 = vadd.f32 %v1692_v52, %v1387_v46  ;;  %v1694_v59 = vadd.f32 %v460_v55, %v214_v38  ;;  %v462_v60 = vpop.f32.mrb[7].mxu0  ;;  %v516_v18 = vadd.f32 %v513_v10, %v512_v13  ;;  %v841_v52 = vlaneseq }
 0x128   :  { %v2144_v61 = vadd.f32 %v462_v60, %v216_v41 }
 0x129   :  { %v2148_v63 = vmax.f32 %v482_v58, 0.0  ;;  %v483_v1 = vadd.f32 %v1694_v59, %v1387_v46  ;;  %v1765_v46 = vld [vmem:[#allocation6 + $0x60] sm:$0xff]   ;;  %v842_v53 = vshrl.u32 %v841_v52, 7 }
 0x12b   :  { %v504_v2 = vadd.f32 %v503_v62, %v2148_v63  ;;  %v2151_v3 = vmax.f32 %v483_v1, 0.0  ;;  %v514_v15 = vmul.f32 %v2148_v63, %v2148_v63  ;;  %v843_v55 = vsub.s32 0, %v842_v53 }
 0x12d   :  { %v505_v4 = vadd.f32 %v504_v2, %v2151_v3  ;;  %v517_v19 = vadd.f32 %v516_v18, %v514_v15  ;;  %v515_v21 = vmul.f32 %v2151_v3, %v2151_v3 }
 0x12f   :  { %v506_v5 = vrot.slane %v505_v4, 4  ;;  %v518_v22 = vadd.f32 %v517_v19, %v515_v21 }
 0x131   :  { %v507_v7 = vadd.f32 %v506_v5, %v505_v4  ;;  %v519_v24 = vrot.slane %v518_v22, 4 }
 0x133   :  { %v508_v0 = vrot.slane %v507_v7, 2 }
 0x135   :  { %v509_v9 = vadd.f32 %v508_v0, %v507_v7 }
 0x137   :  { %v510_v12 = vrot.slane %v509_v9, 1 }
 0x139   :  { %v511_v16 = vadd.f32 %v510_v12, %v509_v9 }
 0x13b   :  { %1533 = vmatmul.mubr.f32.vlgmr.msra.gmra.mrb[8].mxu0 %v511_v16 }
 0x13c   :  { %1666 = vmatpush3.bf16.msra.mxu0 %v2055_v8  ;;  %1567 = vmatprep.mubr.msk.f32.mxu0 %vm1871_vm7, %v1872_v30  ;;  %v520_v8 = vadd.f32 %v519_v24, %v518_v22 }
 0x13d   :  { %1667 = vmatprep.subr.bf16.mxu0 %v1870_v6 }
 0x13e   :  { %v521_v25 = vrot.slane %v520_v8, 2 }
 0x140   :  { %1669 = vmatpush3.bf16.msra.mxu0 %v2065_v11  ;;  %v522_v11 = vadd.f32 %v521_v25, %v520_v8 }
 0x141   :  { %1670 = vmatprep.subr.bf16.mxu0 %v1870_v6 }
 0x144   :  { %1672 = vmatpush3.bf16.msra.mxu0 %v2075_v14  ;;  %v523_v14 = vrot.slane %v522_v11, 1 }
 0x145   :  { %1673 = vmatprep.subr.bf16.mxu0 %v1870_v6 }
 0x148   :  { %1675 = vmatpush3.bf16.msra.mxu0 %v2085_v17  ;;  %v524_v17 = vadd.f32 %v523_v14, %v522_v11 }
 0x149   :  { %1676 = vmatprep.subr.bf16.mxu0 %v1870_v6 }
 0x14c   :  { %1678 = vmatpush3.bf16.msra.mxu0 %v2095_v20  ;;  %v693_v20 = vld [vmem:[%s2243_s4] sm:$0xff] }
 0x14d   :  { %1679 = vmatprep.subr.bf16.mxu0 %v1870_v6 }
 0x150   :  { %1681 = vmatpush3.bf16.msra.mxu0 %v2105_v23  ;;  %v1761_v23 = vld [vmem:[#allocation6 + $0x40] sm:$0xff]  }
 0x151   :  { %1682 = vmatprep.subr.bf16.mxu0 %v1870_v6  ;;  %1580 = vmatprep.subr.bf16.mxu1 %v1761_v23 }
 0x152   :  { %1581 = vmatpush3.bf16.msra.mxu1 %v1761_v23 }
 0x153   :  { %1582 = vmatprep.subr.bf16.mxu1 %v1762_v43 }
 0x154   :  { %1684 = vmatpush3.bf16.msra.mxu0 %v2115_v26 }
 0x155   :  { %1685 = vmatprep.subr.bf16.mxu0 %v1870_v6 }
 0x156   :  { %1583 = vmatpush3.bf16.msra.mxu1 %v1762_v43  ;;  %v1771_v43 = vld [vmem:[#allocation6 + $0x8] sm:$0xff]  }
 0x157   :  { %1584 = vmatprep.subr.bf16.mxu1 %v1763_v44 }
 0x158   :  { %1687 = vmatpush3.bf16.msra.mxu0 %v2125_v29 }
 0x159   :  { %1570 = vmatprep.subr.mxu0 %v1872_v30 }
 0x15a   :  { %1585 = vmatpush3.bf16.msra.mxu1 %v1763_v44 }
 0x15b   :  { %1568 = vmatmul.mubr.f32.vlgmr.msra.gmra.mrb[10].mxu0 %v524_v17  ;;  %1586 = vmatprep.subr.bf16.mxu1 %v1764_v45 }
 0x15c   :  { %1572 = vmatprep.mubr.msk.f32.mxu0 %vm1871_vm7, %v1872_v30  ;;  %1571 = vmatpush3.msra.mxu0 %v693_v20 }
 0x15d   :  { %1575 = vmatprep.subr.mxu0 %v1872_v30 }
 0x15e   :  { %1587 = vmatpush3.bf16.msra.mxu1 %v1764_v45  ;;  %v1772_v45 = vld [vmem:[#allocation6 + $0x10] sm:$0xff]  }
 0x15f   :  { %1588 = vmatprep.subr.bf16.mxu1 %v1765_v46 }
 0x162   :  { %1589 = vmatpush3.bf16.msra.mxu1 %v1765_v46  ;;  %v1773_v46 = vld [vmem:[#allocation6 + $0x18] sm:$0xff]  }
 0x163   :  { %1590 = vmatprep.subr.bf16.mxu1 %v1766_v48 }
 0x166   :  { %1591 = vmatpush3.bf16.msra.mxu1 %v1766_v48  ;;  %v1774_v48 = vld [vmem:[#allocation6 + $0x20] sm:$0xff]  }
 0x167   :  { %1592 = vmatprep.subr.bf16.mxu1 %v1767_v49 }
 0x16a   :  { %1593 = vmatpush3.bf16.msra.mxu1 %v1767_v49  ;;  %v1776_v49 = vld [vmem:[#allocation6 + $0x30] sm:$0xff]  }
 0x20e   :  { %v607_v6 = vpop.f32.mrb[8].mxu0 }
 0x20f   :  { %v1534_v26 = vpop.f32.mrb[9].mxu0  ;;  %v611_v27 = vmul.f32 0.001953125, %v607_v6 }
 0x211   :  { %v683_v29 = vmul.f32 %v611_v27, %v611_v27 }
 0x22e   :  { %v678_v28 = vpop.f32.mrb[10].mxu0 }
 0x22f   :  { %v682_v31 = vmul.f32 0.001953125, %v678_v28  ;;  %v1569_v32 = vpop.f32.mrb[11].mxu0 }
 0x231   :  { %v684_v33 = vsub.f32 %v682_v31, %v683_v29 }
 0x233   :  { %v685_v34 = vmax.f32 %v684_v33, 0.0 }
 0x235   :  { %v687_v35 = vadd.f32 1e-05, %v685_v34 }
 0x237   :  { %1789 = vrsqrt.f32 %v687_v35 }
 0x241   :  { %v1790_v37 = vpop.eup %1789 }
 0x242   :  { %v689_v38 = vmul.f32 %v1790_v37, %v686_v36 }
 0x244   :  { %1573 = vmatmul.mubr.msk.f32.vlgmr.msra.gmra.mrb[12].mxu0 %vm694_vm8, %v689_v38  ;;  %v691_v40 = vmul.f32 %v689_v38, %v611_v27 }
 0x245   :  { %1576 = vmatpush3.msra.mxu0 %v693_v20  ;;  %1577 = vmatprep.mubr.msk.f32.mxu0 %vm1871_vm7, %v1872_v30  ;;  %v1768_v30 = vld [vmem:[#allocation6 + $0x78] sm:$0xff]  }
 0x246   :  { %v692_v41 = vsub.f32 %v690_v39, %v691_v40  ;;  %1594 = vmatprep.subr.bf16.mxu1 %v1768_v30 }
 0x247   :  { %1595 = vmatpush3.bf16.msra.mxu1 %v1768_v30  ;;  %v1777_v30 = vld [vmem:[#allocation6 + $0x38] sm:$0xff]  }
 0x248   :  { %1578 = vmatmul.mubr.msk.f32.vlgmr.msra.gmra.mrb[14].mxu0 %vm694_vm8, %v692_v41  ;;  %1600 = vmatprep.subr.bf16.mxu1 %v1769_v50 }
 0x317   :  { %v764_v58 = vpop.f32.mrb[12].mxu0 }
 0x318   :  { %v844_v59 = vrot.slane %v764_v58, %v843_v55  ;;  %v1574_v60 = vpop.f32.mrb[13].mxu0 }
 0x319   :  { %v1783_v60 = vld [vmem:[#allocation6 + $0x98] sm:$0xff]  }
 0x31a   :  { %v845_v62 = vmul.f32 %v844_v59, %v2142_v57  ;;  %v846_v2 = vmul.f32 %v844_v59, %v2138_v51  ;;  %v847_v4 = vmul.f32 %v844_v59, %v2148_v63  ;;  %v848_v5 = vmul.f32 %v844_v59, %v2151_v3  ;;  %v1782_v59 = vld [vmem:[#allocation6 + $0x90] sm:$0xff]  }
 0x31b   :  { %v837_v1 = vpop.f32.mrb[14].mxu0 }
 0x31c   :  { %v852_v7 = vrot.slane %v837_v1, %v843_v55  ;;  %v1579_v0 = vpop.f32.mrb[15].mxu0  ;;  %v1781_v55 = vld [vmem:[#allocation6 + $0x88] sm:$0xff]  }
 0x31d   :  { %v1785_v1 = vld [vmem:[#allocation6 + $0xa8] sm:$0xff]  }
 0x31e   :  { %v853_v9 = vadd.f32 %v852_v7, %v845_v62  ;;  %v854_v10 = vadd.f32 %v852_v7, %v846_v2  ;;  %v855_v12 = vadd.f32 %v852_v7, %v847_v4  ;;  %v856_v13 = vadd.f32 %v852_v7, %v848_v5  ;;  %v1784_v62 = vld [vmem:[#allocation6 + $0xa0] sm:$0xff]   ;;  %v1786_v2 = vld [vmem:[#allocation6 + $0xb0] sm:$0xff]   ;;  %v1787_v4 = vld [vmem:[#allocation6 + $0xb8] sm:$0xff]  }
 0x31f   :  { %v1427_v0 = vld [vmem:[%s2246_s7] ss:$0 sm:$0xff]  ;;  %s1873_s7 = smov [#allocation8]  }
 0x320   :  { %v1428_v15 = vpack.c.bf16 %v853_v9, %v853_v9  ;;  %v1429_v16 = vpack.c.bf16 %v854_v10, %v854_v10  ;;  %v1430_v18 = vpack.c.bf16 %v855_v12, %v855_v12  ;;  %v1431_v19 = vpack.c.bf16 %v856_v13, %v856_v13  ;;  %v1388_v10 = vld [vmem:[%s2245_s6] ss:$0 sm:$0xff]  ;;  %s1334_s20 = sshll.u32 %s1873_s7, 4  ;;  %s1335_s20 = int_to_ptr.vmem [resolvable:$true] %s1334_s20 }
 0x321   :  { %s1835_s6 = scalar_lea.vmem %s1335_s20, 512  ;;  %p1840_p3 = scmp.lt.s32.totalorder %s1335_s20, %s1335_s20 }
 0x322   :  { %v873_v21 = vrot.slane %v1428_v15, 6  ;;  %v875_v22 = vrot.slane %v1429_v16, 6  ;;  %v878_v57 = vrot.slane %v1430_v18, 6  ;;  %v880_v24 = vrot.slane %v1431_v19, 6  ;;  %p1836_p2 = scmp.ne.s32.totalorder %s1335_s20, %s1835_s6  ;;  %p1841_p4 = scmp.lt.s32.totalorder %s1835_s6, %s1835_s6 }
 0x323   :  { %v497_v18 = vadd.f32 %v2140_v54, %v1388_v10 }
 0x324   :  { %v874_v8 = vrot.slane %v873_v21, 4  ;;  %v877_v51 = vrot.slane %v875_v22, 4  ;;  %v879_v25 = vrot.slane %v878_v57, 4  ;;  %v882_v63 = vrot.slane %v880_v24, 4  ;;  %889 = vst [vmem:[#allocation2] sm:$0xc] %v873_v21  ;;  %p1842_p5 = por %p1841_p4, %p1840_p3 }
 0x325   :  { %892 = vst [vmem:[#allocation2 + $0xc] sm:$0xc] %v878_v57  ;;  %v495_v57 = vadd.f32 %v2131_v42, %v1388_v10 }
 0x326   :  { %v876_v3 = vsel %vm2024_vm6, %v874_v8, %v875_v22  ;;  %v881_v11 = vsel %vm2024_vm6, %v879_v25, %v880_v24  ;;  %891 = vst [vmem:[#allocation2 + $0x8] sm:$0x3] %v877_v51  ;;  %894 = vst [vmem:[#allocation2 + $0x14] sm:$0x3] %v882_v63  ;;  %v498_v51 = vadd.f32 %v2144_v61, %v1388_v10  ;;  %p1843_p6 = pnand %p1842_p5, %p1836_p2 }
 0x327   :  { %890 = vst [vmem:[#allocation2 + $0x4] sm:$0xf] %v876_v3  ;;  %893 = vst [vmem:[#allocation2 + $0x10] sm:$0xf] %v881_v11  ;;  %v496_v3 = vadd.f32 %v2136_v47, %v1388_v10 }
 0x32b   :  { %v915_v14 = vld [vmem:[#allocation2] sm:$0xc] }
 0x32c   :  { %v918_v20 = vld [vmem:[#allocation2 + $0xc] sm:$0xc]  ;;  %v1395_v29 = vrot.slane %v915_v14, 10 }
 0x32d   :  { %v917_v17 = vld [vmem:[#allocation2 + $0x8] sm:$0x3]  ;;  %v920_v26 = vld [vmem:[#allocation2 + $0x14] sm:$0x3]  ;;  %v1396_v31 = vrot.slane %v918_v20, 10 }
 0x32e   :  { %v916_v23 = vld [vmem:[#allocation2 + $0x4] sm:$0xf]  ;;  %v2202_v6 = vld [vmem:[#allocation2 + $0x10] sm:$0xf]  ;;  %v932_v33 = vrot.slane %v917_v17, 6  ;;  %v939_v35 = vrot.slane %v920_v26, 6 }
 0x32f   :  { %v929_v27 = vrot.slane %v916_v23, 6  ;;  %v936_v28 = vrot.slane %v2202_v6, 6  ;;  %v1770_v44 = vld [vmem:[#allocation2] sm:$0xff]   ;;  %v1172_v52 = vld [vmem:[#allocation2 + $0x8] sm:$0xf]  ;;  %v1778_v53 = vld [vmem:[#allocation2 + $0xc] sm:$0xff]  }
 0x330   :  { %v1417_v58 = vcombine.low %v916_v23, %v1172_v52  ;;  %v1173_v5 = vld [vmem:[#allocation2 + $0x14] sm:$0xf] }
 0x331   :  { %v931_v32 = vrot.slane %v929_v27, 4  ;;  %v938_v34 = vrot.slane %v936_v28, 4  ;;  %v930_v36 = vsel %vm2024_vm6, %v1395_v29, %v929_v27  ;;  %v937_v38 = vsel %vm2024_vm6, %v1396_v31, %v936_v28 }
 0x332   :  { %v1418_v7 = vcombine.low %v2202_v6, %v1173_v5 }
 0x333   :  { %v933_v37 = vsel %vm2024_vm6, %v931_v32, %v932_v33  ;;  %v940_v39 = vsel %vm2024_vm6, %v938_v34, %v939_v35 }
 0x334   :  { %v1397_v40 = vcombine.low %v930_v36, %v933_v37  ;;  %v1398_v41 = vcombine.low %v937_v38, %v940_v39 }
 0x336   :  { %1596 = vmatprep.mubr.bf16.mxu1 %v1397_v40 }
 0x337   :  { %1597 = vmatmul.mubr.bf16.vlgmr.msra.gmra.mrb[8].mxu1 %v1398_v41 }
 0x338   :  { %1601 = vmatpush3.bf16.msra.mxu1 %v1769_v50  ;;  %1616 = vmatprep.mubr.bf16.mxu1 %v1770_v44  ;;  %v1779_v50 = vld [vmem:[#allocation6 + $0x80] sm:$0xff]  }
 0x339   :  { %1602 = vmatprep.subr.bf16.mxu1 %v1771_v43 }
 0x33c   :  { %1603 = vmatpush3.bf16.msra.mxu1 %v1771_v43 }
 0x33d   :  { %1604 = vmatprep.subr.bf16.mxu1 %v1772_v45 }
 0x340   :  { %1605 = vmatpush3.bf16.msra.mxu1 %v1772_v45 }
 0x341   :  { %1606 = vmatprep.subr.bf16.mxu1 %v1773_v46 }
 0x344   :  { %1607 = vmatpush3.bf16.msra.mxu1 %v1773_v46 }
 0x345   :  { %1608 = vmatprep.subr.bf16.mxu1 %v1774_v48 }
 0x348   :  { %1609 = vmatpush3.bf16.msra.mxu1 %v1774_v48 }
 0x349   :  { %1610 = vmatprep.subr.bf16.mxu1 %v1775_v56 }
 0x34c   :  { %1611 = vmatpush3.bf16.msra.mxu1 %v1775_v56 }
 0x34d   :  { %1612 = vmatprep.subr.bf16.mxu1 %v1776_v49 }
 0x350   :  { %1613 = vmatpush3.bf16.msra.mxu1 %v1776_v49 }
 0x351   :  { %1614 = vmatprep.subr.bf16.mxu1 %v1777_v30 }
 0x354   :  { %1615 = vmatpush3.bf16.msra.mxu1 %v1777_v30 }
 0x355   :  { %1620 = vmatprep.subr.bf16.mxu1 %v1779_v50 }
 0x357   :  { %1617 = vmatmul.mubr.bf16.vlgmr.msra.gmra.mrb[8].mxu1 %v1778_v53 }
 0x358   :  { %1621 = vmatpush3.bf16.msra.mxu1 %v1779_v50  ;;  %1636 = vmatprep.mubr.bf16.mxu1 %v1417_v58 }
 0x359   :  { %1622 = vmatprep.subr.bf16.mxu1 %v1781_v55 }
 0x35c   :  { %1623 = vmatpush3.bf16.msra.mxu1 %v1781_v55 }
 0x35d   :  { %1624 = vmatprep.subr.bf16.mxu1 %v1782_v59 }
 0x360   :  { %1625 = vmatpush3.bf16.msra.mxu1 %v1782_v59 }
 0x361   :  { %1626 = vmatprep.subr.bf16.mxu1 %v1783_v60 }
 0x364   :  { %1627 = vmatpush3.bf16.msra.mxu1 %v1783_v60 }
 0x365   :  { %1628 = vmatprep.subr.bf16.mxu1 %v1784_v62 }
 0x368   :  { %1629 = vmatpush3.bf16.msra.mxu1 %v1784_v62 }
 0x369   :  { %1630 = vmatprep.subr.bf16.mxu1 %v1785_v1 }
 0x36c   :  { %1631 = vmatpush3.bf16.msra.mxu1 %v1785_v1 }
 0x36d   :  { %1632 = vmatprep.subr.bf16.mxu1 %v1786_v2 }
 0x370   :  { %1633 = vmatpush3.bf16.msra.mxu1 %v1786_v2 }
 0x371   :  { %1634 = vmatprep.subr.bf16.mxu1 %v1787_v4 }
 0x374   :  { %1635 = vmatpush3.bf16.msra.mxu1 %v1787_v4 }
 0x377   :  { %1637 = vmatmul.mubr.bf16.vlgmr.msra.gmra.mrb[8].mxu1 %v1418_v7 }
 0x44a   :  { %v1638_v9 = vpop.f32.mrb[8].mxu1 }
 0x44b   :  { %v1311_v12 = vadd.f32 %v1638_v9, %v1427_v0  ;;  %v1283_v13 = vpop.f32.mrb[9].mxu1 }
 0x44c   :  { %v1309_v15 = vadd.f32 %v1427_v0, %v1283_v13  ;;  %v1639_v16 = vpop.f32.mrb[10].mxu1 }
 0x44d   :  { %v1315_v19 = vmax.f32 %v1311_v12, 0.0  ;;  %v1312_v21 = vadd.f32 %v1639_v16, %v1427_v0  ;;  %v1286_v22 = vpop.f32.mrb[11].mxu1 }
 0x44e   :  { %v1313_v24 = vmax.f32 %v1309_v15, 0.0  ;;  %v1310_v8 = vadd.f32 %v1427_v0, %v1286_v22 }
 0x44f   :  { %v1323_v25 = vadd.f32 %v1315_v19, %v497_v18  ;;  %v1316_v63 = vmax.f32 %v1312_v21, 0.0 }
 0x450   :  { %v1321_v11 = vadd.f32 %v1313_v24, %v495_v57  ;;  %v1314_v14 = vmax.f32 %v1310_v8, 0.0 }
 0x451   :  { %1327 = vst [vmem:[#allocation8 + $0x10] sm:$0xff] %v1323_v25  ;;  %v1324_v17 = vadd.f32 %v1316_v63, %v498_v51 }
 0x452   :  { %1325 = vst [vmem:[#allocation8] sm:$0xff] %v1321_v11  ;;  %v1322_v54 = vadd.f32 %v1314_v14, %v496_v3 }
 0x453   :  { %1328 = vst [vmem:[#allocation8 + $0x18] sm:$0xff] %v1324_v17 }
 0x454   :  { %1326 = vst [vmem:[#allocation8 + $0x8] sm:$0xff] %v1322_v54 }
 0x455   :  { %1846 = shalt.err (!%p1843_p6)
}
 0x456   :  { %s1847_s0 = scalar_lea.hbm %s2249_s10, 512 }
 0x457   :  { %p1848_p7 = scmp.ne.s32.totalorder %s2249_s10, %s1847_s0  ;;  %p1851_p8 = scmp.lt.u32.totalorder %s1847_s0, %s2249_s10 }
 0x459   :  { %p1853_p9 = pnand %p1851_p8, %p1848_p7 }
 0x45b   :  { %1856 = shalt.err (!%p1853_p9)
}
 0x45c   :  { %1340 = dma.vmem_to_hbm [thread:$0]  %s1335_s20, 512, %s2249_s10, [#allocation5], %s1864_s23, %s1864_s23, %s1865_s24  }
 0x45d   :  { %1861 = dma.done.wait [#allocation5], 512  }
 0x45e   :  { %1862 = vsyncadd [#allocation5], 4294966784 }
 0x45f   :  { %1344 = vsyncpa [#allocation4], 1 }
 0x460   :  { %1345 = vsyncpa [#allocation7], 1 }
 0x461   :  { %1346 = vsyncpa [#allocation5], 1 }

</bundles_post_ra>
